<compile_context>
chip_gen: v5e
topology: v5e:2x2
jax: 0.10.0
libtpu: 0.0.40
codegen_flags: <defaults>
</compile_context>

<pallas_src>
import jax
import jax.numpy as jnp
from jax.experimental import pallas as pl
from jax.experimental.pallas import tpu as pltpu


_TARGET_BLOCK_BYTES = 4 * 1024 * 1024  # ~4 MiB per x/out block


def _fbn_affine_kernel(s_ref, b_ref, x_ref, o_ref):
    # s_ref/b_ref are (tr, 1) or (1, tl) f32 blocks; broadcast against the
    # (tr, tl) x tile. Compute in f32, store in the output dtype (bf16-safe).
    x = x_ref[...].astype(jnp.float32)
    o_ref[...] = (x * s_ref[...] + b_ref[...]).astype(o_ref.dtype)


def _largest_lane_divisor(lanes, cap):
    """Largest d*128 <= cap such that d divides lanes//128 (lanes % 128 == 0)."""
    m = lanes // 128
    cap_d = max(1, cap // 128)
    best = 1
    d = 1
    while d * d <= m:
        if m % d == 0:
            for cand in (d, m // d):
                if cand <= cap_d and cand > best:
                    best = cand
        d += 1
    return best * 128


def _choose_tiles(rows, lanes, elem_bytes, target_bytes=_TARGET_BLOCK_BYTES):
    """Pick a (tr, tl) tile: lane/sublane-dense, ~target_bytes per block."""
    sub = 16 if elem_bytes == 2 else 8
    target_elems = max(target_bytes // elem_bytes, sub * 128)

    if lanes % 128 != 0 or sub * lanes <= target_elems:
        tl = lanes  # full lane extent (always layout-legal, no remainder tile)
    else:
        cap = max(128, (target_elems // sub) // 128 * 128)
        tl = _largest_lane_divisor(lanes, cap)  # multiple of 128, divides lanes

    max_rows = max(sub, (target_elems // tl) // sub * sub)
    tr = rows if max_rows >= rows else max_rows  # full extent or multiple of 8/16
    return tr, tl


def _bn_affine_2d(x2, s2, b2, *, donate_x=False):
    """out = x2 * s2 + b2 on a dense 2D slab; s2/b2 are (R,1) or (1,M) f32."""
    R, M = x2.shape
    elem = jnp.dtype(x2.dtype).itemsize
    tr, tl = _choose_tiles(R, M, elem)
    grid = (pl.cdiv(R, tr), pl.cdiv(M, tl))

    def _param_spec(p):
        if p.shape[0] == 1:  # (1, M): per-lane params
            return pl.BlockSpec((1, tl), lambda i, j: (0, j))
        return pl.BlockSpec((tr, 1), lambda i, j: (i, 0))  # (R, 1): per-row

    x_spec = pl.BlockSpec((tr, tl), lambda i, j: (i, j))
    o_spec = pl.BlockSpec((tr, tl), lambda i, j: (i, j))

    # Double-buffered input + output blocks (~4x block bytes) plus headroom.
    block_bytes = tr * tl * elem
    vmem_limit = int(min(48 * 2**20, max(16 * 2**20, 5 * block_bytes + (1 << 20))))

    return pl.pallas_call(
        _fbn_affine_kernel,
        out_shape=jax.ShapeDtypeStruct((R, M), x2.dtype),
        grid_spec=pl.GridSpec(
            grid=grid,
            in_specs=[_param_spec(s2), _param_spec(b2), x_spec],
            out_specs=o_spec,
        ),
        compiler_params=pltpu.CompilerParams(
            dimension_semantics=("parallel", "parallel"),
            vmem_limit_bytes=vmem_limit,
        ),
        input_output_aliases=({2: 0} if donate_x else {}),
    )(s2, b2, x2)


def frozen_batch_norm_2d(x, weight, bias, running_mean, running_var,
                         eps=1e-5, *, donate_x=False):
    """FrozenBatchNorm2d forward: x * scale + shift with frozen per-channel stats.

    x: (N, C, H, W); weight/bias/running_mean/running_var: (C,).
    """
    N, C, H, W = x.shape
    L = H * W

    # Fold frozen buffers + eps into a per-channel affine (O(C) in plain JAX);
    # removes rsqrt / extra muls from the per-element kernel work.
    scale = weight.astype(jnp.float32) * jax.lax.rsqrt(
        running_var.astype(jnp.float32) + jnp.float32(eps))
    shift = bias.astype(jnp.float32) - running_mean.astype(jnp.float32) * scale

    if L % 128 == 0:
        # Lane-dense, C-independent view: rows = N*C (batch, channel) rows.
        R = N * C
        x2 = x.reshape(R, L)
        s2 = jnp.tile(scale, N).reshape(R, 1)   # row r -> channel r % C
        b2 = jnp.tile(shift, N).reshape(R, 1)
        out2 = _bn_affine_2d(x2, s2, b2, donate_x=donate_x)
        return out2.reshape(N, C, H, W)

    # H*W not lane-aligned: put channel*spatial on the lane axis instead and
    # feed per-lane scale/shift vectors; pad the lane axis to 128 if needed.
    M = C * L
    pad = (-M) % 128
    x2 = x.reshape(N, M)
    s2 = jnp.repeat(scale, L)
    b2 = jnp.repeat(shift, L)
    if pad:
        # TODO(synk): padding adds pad/M extra HBM traffic; only taken when
        # neither H*W nor C*H*W is a multiple of 128.
        x2 = jnp.pad(x2, ((0, 0), (0, pad)))
        s2 = jnp.pad(s2, (0, pad))
        b2 = jnp.pad(b2, (0, pad))
    out2 = _bn_affine_2d(x2, s2.reshape(1, -1), b2.reshape(1, -1),
                         donate_x=donate_x and pad == 0)
    if pad:
        out2 = out2[:, :M]
    return out2.reshape(N, C, H, W)


if __name__ == "__main__":
    key = jax.random.PRNGKey(0)
    kx, kw, kb, km, kv = jax.random.split(key, 5)

    N, C, H, W = 2, 4, 16, 16
    eps = 1e-5

    x = jax.random.normal(kx, (N, C, H, W), dtype=jnp.float32)
    # Deterministic "frozen" buffers (module init is ones/zeros; perturb so the
    # test is non-trivial).
    weight = 1.0 + 0.1 * jax.random.normal(kw, (C,), dtype=jnp.float32)
    bias = 0.1 * jax.random.normal(kb, (C,), dtype=jnp.float32)
    running_mean = 0.2 * jax.random.normal(km, (C,), dtype=jnp.float32)
    running_var = jnp.abs(jax.random.normal(kv, (C,), dtype=jnp.float32)) + 0.5

    def ref_fn(xx, w, b, rm, rv, e):
        w4 = w.reshape(1, -1, 1, 1)
        b4 = b.reshape(1, -1, 1, 1)
        rv4 = rv.reshape(1, -1, 1, 1)
        rm4 = rm.reshape(1, -1, 1, 1)
        s = w4 * jax.lax.rsqrt(rv4 + e)
        return xx * s + (b4 - rm4 * s)

    # Lane-aligned path (H*W = 256).
    out = frozen_batch_norm_2d(x, weight, bias, running_mean, running_var, eps)
    out = jax.block_until_ready(out)
    ref = ref_fn(x, weight, bias, running_mean, running_var, eps)
    assert out.shape == ref.shape and out.dtype == ref.dtype
    assert jnp.allclose(out, ref, atol=1e-5, rtol=1e-5)

    # Non-lane-aligned fallback path (H*W = 49, ResNet-like tail spatial).
    x_odd = jax.random.normal(kx, (N, C, 7, 7), dtype=jnp.float32)
    out_odd = jax.block_until_ready(
        frozen_batch_norm_2d(x_odd, weight, bias, running_mean, running_var, eps))
    ref_odd = ref_fn(x_odd, weight, bias, running_mean, running_var, eps)
    assert jnp.allclose(out_odd, ref_odd, atol=1e-5, rtol=1e-5)

    print("KERNEL_OK")
</pallas_src>

<mosaic_0001>
module attributes {stable_mosaic.version = 11 : i64} {
  func.func @_fbn_affine_kernel(%arg0: i32, %arg1: i32, %arg2: memref<8x1xf32, #tpu.memory_space<vmem>>, %arg3: memref<8x1xf32, #tpu.memory_space<vmem>>, %arg4: memref<8x256xf32, #tpu.memory_space<vmem>>, %arg5: memref<8x256xf32, #tpu.memory_space<vmem>>) attributes {dimension_semantics = [#tpu.dimension_semantics<parallel>, #tpu.dimension_semantics<parallel>], iteration_bounds = array<i64: 1, 1>, scalar_prefetch = 0 : i64, scratch_operands = 0 : i64, tpu.core_type = #tpu.core_type<tc>, window_params = [{transform_indices = @transform_0, window_bounds = array<i64: 8, 1>}, {transform_indices = @transform_1, window_bounds = array<i64: 8, 1>}, {transform_indices = @transform_2, window_bounds = array<i64: 8, 256>}, {transform_indices = @transform_3, window_bounds = array<i64: 8, 256>}]} {
    %c0 = arith.constant 0 : index
    %c0_0 = arith.constant 0 : index
    %0 = vector.load %arg4[%c0, %c0_0] : memref<8x256xf32, #tpu.memory_space<vmem>>, vector<8x256xf32>
    %c0_1 = arith.constant 0 : index
    %c0_2 = arith.constant 0 : index
    %1 = vector.load %arg2[%c0_1, %c0_2] : memref<8x1xf32, #tpu.memory_space<vmem>>, vector<8x1xf32>
    %2 = vector.broadcast %1 : vector<8x1xf32> to vector<8x256xf32>
    %3 = arith.mulf %0, %2 : vector<8x256xf32>
    %c0_3 = arith.constant 0 : index
    %c0_4 = arith.constant 0 : index
    %4 = vector.load %arg3[%c0_3, %c0_4] : memref<8x1xf32, #tpu.memory_space<vmem>>, vector<8x1xf32>
    %5 = vector.broadcast %4 : vector<8x1xf32> to vector<8x256xf32>
    %6 = arith.addf %3, %5 : vector<8x256xf32>
    %c0_5 = arith.constant 0 : index
    %c0_6 = arith.constant 0 : index
    %7 = vector.load %arg5[%c0_5, %c0_6] : memref<8x256xf32, #tpu.memory_space<vmem>>, vector<8x256xf32>
    tpu.vector_store %arg5[%c0_5, %c0_6], %6 {strides = array<i32>} : memref<8x256xf32, #tpu.memory_space<vmem>>, vector<8x256xf32>,
    return
  }
  func.func @transform_0(%arg0: i32, %arg1: i32) -> (i32, i32) {
    %c0_i32 = arith.constant 0 : i32
    %c0_i32_0 = arith.constant 0 : i32
    return %arg0, %c0_i32 : i32, i32
  }
  func.func @transform_1(%arg0: i32, %arg1: i32) -> (i32, i32) {
    %c0_i32 = arith.constant 0 : i32
    %c0_i32_0 = arith.constant 0 : i32
    return %arg0, %c0_i32 : i32, i32
  }
  func.func @transform_2(%arg0: i32, %arg1: i32) -> (i32, i32) {
    %c0_i32 = arith.constant 0 : i32
    return %arg0, %arg1 : i32, i32
  }
  func.func @transform_3(%arg0: i32, %arg1: i32) -> (i32, i32) {
    %c0_i32 = arith.constant 0 : i32
    return %arg0, %arg1 : i32, i32
  }
}

</mosaic_0001>

<bundles_post_ra>
// kernel: tpu_custom_call.1
= control target key start
LH: loop header
LB: loop body
LE: loop exit
PB: predicated region body
PF: predicated region fallthrough
CT: control target
= control target key end

     0   :  { %s117_s0 = inlined_call_operand.vmem [shape: f32[8,1], index: 0, kind: input, shape index: {}]   ;;  %s118_s1 = inlined_call_operand.vmem [shape: f32[8,1], index: 1, kind: input, shape index: {}]   ;;  %s119_s2 = inlined_call_operand.vmem [shape: f32[8,256], index: 2, kind: input, shape index: {}]   ;;  %s120_s3 = inlined_call_operand.hbm [shape: f32[8,256], index: 3, kind: output, shape index: {}]  }
   0x1   :  { %v17_v0 = vld [vmem:[%s117_s0] sm:$0xff] }
   0x2   :  { %8 = vsyncpa [#allocation3], 0  ;;  %v80_v1 = vmov 0   ;;  %v25_v2 = vld [vmem:[%s118_s1] sm:$0xff]  ;;  %v16_v5 = vld [vmem:[%s119_s2 + $0x8] sm:$0xff]  ;;  %s81_s0 = smov [#allocation2]  }
   0x3   :  { %53 = vset.pattern.permute.xlu0 %v80_v1  ;;  %v15_v4 = vld [vmem:[%s119_s2] sm:$0xff]  ;;  %s40_s20 = sshll.u32 %s81_s0, 4  ;;  %s42_s23 = sshll.u32 %s120_s3, 4  ;;  %s41_s20 = int_to_ptr.vmem [resolvable:$true] %s40_s20  ;;  %s43_s23 = int_to_ptr.hbm [resolvable:$true] %s42_s23 }
   0x4   :  { %20 = vperm.xlu0 %53, %v17_v0  }
   0xc   :  { %28 = vperm.xlu0 %53, %v25_v2  }
  0x76   :  { %v21_v3 = vpop.permute.xlu0 %20 }
  0x77   :  { %v23_v6 = vmul.f32 %v21_v3, %v15_v4  ;;  %v24_v7 = vmul.f32 %v21_v3, %v16_v5 }
  0x7e   :  { %v29_v8 = vpop.permute.xlu0 %28 }
  0x7f   :  { %v31_v9 = vadd.f32 %v29_v8, %v23_v6  ;;  %v32_v10 = vadd.f32 %v29_v8, %v24_v7 }
  0x81   :  { %33 = vst [vmem:[#allocation2] sm:$0xff] %v31_v9 }
  0x82   :  { %34 = vst [vmem:[#allocation2 + $0x8] sm:$0xff] %v32_v10 }
  0x83   :  { %45 = dma.vmem_to_hbm [thread:$0]  %s41_s20, 256, %s43_s23, [#allocation3]  }
  0x84   :  { %78 = dma.done.wait [#allocation3], 256  }
  0x85   :  { %79 = vsyncadd [#allocation3], 4294967040 }
  0x86   :  { %50 = vsyncpa [#allocation3], 1 }

</bundles_post_ra>
